<compile_context>
chip_gen: v5e
topology: v5e:2x2
jax: 0.10.0
libtpu: 0.0.40
codegen_flags: <defaults>
</compile_context>

<pallas_src>
from math import sqrt

import jax
import jax.numpy as jnp
from jax.experimental import pallas as pl
from jax.experimental.pallas import tpu as pltpu


def planar_flow_kernel(scal_ref, u_ref, w_ref, z_ref, x_ref, ld_ref):
    b = scal_ref[0]          # scalar bias            (SMEM)
    uw = scal_ref[1]         # u_hat . w, precomputed (SMEM)

    z = z_ref[...].astype(jnp.float32)       # (TILE_B, D)
    u = u_ref[...].astype(jnp.float32)       # (1, D)  constrained u
    w = w_ref[...].astype(jnp.float32)       # (1, D)

    # hidden = w . z_row + b  ->  (TILE_B, 1)   [VPU mul + XLU lane reduce]
    hidden = jnp.sum(z * w, axis=-1, keepdims=True) + b
    th = jnp.tanh(hidden)                                     # EUP

    # x = z + u_hat * tanh(hidden)
    x_ref[...] = (z + u * th).astype(x_ref.dtype)             # (TILE_B, D)

    # log_det = log(|1 + (u_hat.w) * (1 - tanh^2)| + 1e-15), always float32
    h_prime = 1.0 - th * th                                   # (TILE_B, 1)
    ld_ref[...] = jnp.log(jnp.abs(1.0 + uw * h_prime) + 1e-15)


def _round_up(x, m):
    return ((x + m - 1) // m) * m


def _choose_tile_b(batch, data_dim, itemsize):
    # Double-buffered z-in + x-out dominate VMEM: ~4 * TILE_B * D * itemsize.
    # An ~8 MiB budget stays well inside the smallest scoped-VMEM default
    # (16 MiB on v5e) and leaves headroom on v7x's 64 MiB physical VMEM,
    # while tiles >= 512 rows keep the kernel near the HBM roofline.
    budget = 8 * 1024 * 1024
    tile = budget // max(1, 4 * data_dim * itemsize)
    tile = max(8, min(tile, 4096))
    if tile >= 128:
        tile = (tile // 128) * 128
    else:
        tile = (tile // 8) * 8
    # Don't over-pad tiny batches.
    b_ceil = _round_up(batch, 128 if batch >= 128 else 8)
    return min(tile, b_ceil)


def planar_flow_forward(z, u, w, b):
    """z: (B, D); u, w: (D,); b: (1,). Returns (x: (B, D), log_det: (B,) f32)."""
    B, D = z.shape

    # constrained_u: tiny scalar glue, plain JAX (numerically safe softplus).
    u32, w32 = u.astype(jnp.float32), w.astype(jnp.float32)
    wu = jnp.dot(w32, u32)
    m_wu = jax.nn.softplus(wu) - 1.0
    u_hat = u32 + (m_wu - wu) * (w32 / (jnp.sum(w32 * w32) + 1e-15))
    uw_hat = jnp.dot(u_hat, w32)                        # hoisted out of the kernel

    tile_b = _choose_tile_b(B, D, jnp.dtype(z.dtype).itemsize)
    b_pad = _round_up(B, tile_b)
    num_tiles = b_pad // tile_b

    z_pad = z if b_pad == B else jnp.pad(z, ((0, b_pad - B), (0, 0)))
    scal = jnp.stack([b.astype(jnp.float32)[0], uw_hat])          # (2,) SMEM

    x, ld = pl.pallas_call(
        planar_flow_kernel,
        grid=(num_tiles,),
        out_shape=(
            jax.ShapeDtypeStruct((b_pad, D), z.dtype),
            jax.ShapeDtypeStruct((b_pad, 1), jnp.float32),
        ),
        in_specs=[
            pl.BlockSpec(memory_space=pltpu.MemorySpace.SMEM),     # [b, u_hat.w]
            pl.BlockSpec((1, D), lambda i: (0, 0)),                # u_hat (resident)
            pl.BlockSpec((1, D), lambda i: (0, 0)),                # w     (resident)
            pl.BlockSpec((tile_b, D), lambda i: (i, 0)),           # z tile
        ],
        out_specs=(
            pl.BlockSpec((tile_b, D), lambda i: (i, 0)),           # x tile
            pl.BlockSpec((tile_b, 1), lambda i: (i, 0)),           # log_det column
        ),
        compiler_params=pltpu.CompilerParams(
            dimension_semantics=("parallel",),          # dual-TC sharding on v7x
            vmem_limit_bytes=32 * 1024 * 1024,
        ),
        # TODO(synk): optional input_output_aliases={3: 0} to alias z->x (halves
        # HBM footprint) once callers no longer need z after the flow step.
        # TODO(synk): for D << 128, pack 128/D batch rows per vreg row (tiled w
        # + segmented lane reduce) to recover ~128/D vector-lane utilization.
    )(scal, u_hat.reshape(1, D), w32.reshape(1, D), z_pad)

    if b_pad != B:
        x = x[:B]
    log_det = ld.reshape(-1)[:B]
    return x, log_det


if __name__ == "__main__":
    B, D = 8, 32
    key = jax.random.PRNGKey(0)
    k_u, k_w, k_b, k_z = jax.random.split(key, 4)

    # Deterministic parameter init mirroring torch.rand(...) / sqrt(data_dim)
    u = jax.random.uniform(k_u, (D,), jnp.float32) / sqrt(D)
    w = jax.random.uniform(k_w, (D,), jnp.float32) / sqrt(D)
    b = jax.random.uniform(k_b, (1,), jnp.float32) / sqrt(D)
    z = jax.random.normal(k_z, (B, D), jnp.float32)

    x, log_det = planar_flow_forward(z, u, w, b)
    jax.block_until_ready((x, log_det))

    # Pure-JAX reference (mirrors the PyTorch forward exactly).
    wu = jnp.dot(w, u)
    u_hat = u + (jax.nn.softplus(wu) - 1.0 - wu) * (w / (jnp.sum(w * w) + 1e-15))
    hidden = z @ w + b                                        # (B,)
    th = jnp.tanh(hidden)
    x_ref = z + u_hat[None, :] * th[:, None]                  # (B, D)
    ld_ref = jnp.log(jnp.abs(1.0 + jnp.dot(u_hat, w) * (1.0 - th ** 2)) + 1e-15)

    assert x.shape == (B, D) and log_det.shape == (B,)
    assert jnp.allclose(x, x_ref, atol=1e-5, rtol=1e-5)
    assert jnp.allclose(log_det, ld_ref, atol=1e-5, rtol=1e-5)
    print("KERNEL_OK")
</pallas_src>

<mosaic_0001>
module attributes {stable_mosaic.version = 11 : i64} {
  func.func @planar_flow_kernel(%arg0: i32, %arg1: memref<2xf32, #tpu.memory_space<smem>>, %arg2: memref<1x32xf32, #tpu.memory_space<vmem>>, %arg3: memref<1x32xf32, #tpu.memory_space<vmem>>, %arg4: memref<8x32xf32, #tpu.memory_space<vmem>>, %arg5: memref<8x32xf32, #tpu.memory_space<vmem>>, %arg6: memref<8x1xf32, #tpu.memory_space<vmem>>) attributes {dimension_semantics = [#tpu.dimension_semantics<parallel>], iteration_bounds = array<i64: 1>, scalar_prefetch = 0 : i64, scratch_operands = 0 : i64, tpu.core_type = #tpu.core_type<tc>, window_params = [{transform_indices = @transform_0, window_bounds = array<i64: 2>}, {pipeline_mode = #tpu.pipeline_mode<synchronous>, transform_indices = @transform_1, window_bounds = array<i64: 1, 32>}, {pipeline_mode = #tpu.pipeline_mode<synchronous>, transform_indices = @transform_2, window_bounds = array<i64: 1, 32>}, {transform_indices = @transform_3, window_bounds = array<i64: 8, 32>}, {transform_indices = @transform_4, window_bounds = array<i64: 8, 32>}, {transform_indices = @transform_5, window_bounds = array<i64: 8, 1>}]} {
    %c0 = arith.constant 0 : index
    %0 = memref.load %arg1[%c0] : memref<2xf32, #tpu.memory_space<smem>>
    %c1 = arith.constant 1 : index
    %1 = memref.load %arg1[%c1] : memref<2xf32, #tpu.memory_space<smem>>
    %c0_0 = arith.constant 0 : index
    %c0_1 = arith.constant 0 : index
    %2 = vector.load %arg4[%c0_0, %c0_1] : memref<8x32xf32, #tpu.memory_space<vmem>>, vector<8x32xf32>
    %c0_2 = arith.constant 0 : index
    %c0_3 = arith.constant 0 : index
    %3 = vector.load %arg2[%c0_2, %c0_3] : memref<1x32xf32, #tpu.memory_space<vmem>>, vector<1x32xf32>
    %c0_4 = arith.constant 0 : index
    %c0_5 = arith.constant 0 : index
    %4 = vector.load %arg3[%c0_4, %c0_5] : memref<1x32xf32, #tpu.memory_space<vmem>>, vector<1x32xf32>
    %5 = vector.broadcast %4 : vector<1x32xf32> to vector<8x32xf32>
    %6 = arith.mulf %2, %5 : vector<8x32xf32>
    %cst = arith.constant dense<0.000000e+00> : vector<8xf32>
    %7 = vector.multi_reduction <add>, %6, %cst [1] : vector<8x32xf32> to vector<8xf32>
    %8 = vector.shape_cast %7 : vector<8xf32> to vector<8x1xf32>
    %9 = vector.broadcast %0 : f32 to vector<8x1xf32>
    %10 = arith.addf %8, %9 : vector<8x1xf32>
    %11 = math.tanh %10 : vector<8x1xf32>
    %12 = vector.broadcast %3 : vector<1x32xf32> to vector<8x32xf32>
    %13 = vector.broadcast %11 : vector<8x1xf32> to vector<8x32xf32>
    %14 = arith.mulf %12, %13 : vector<8x32xf32>
    %15 = arith.addf %2, %14 : vector<8x32xf32>
    %c0_6 = arith.constant 0 : index
    %c0_7 = arith.constant 0 : index
    %16 = vector.load %arg5[%c0_6, %c0_7] : memref<8x32xf32, #tpu.memory_space<vmem>>, vector<8x32xf32>
    tpu.vector_store %arg5[%c0_6, %c0_7], %15 {strides = array<i32>} : memref<8x32xf32, #tpu.memory_space<vmem>>, vector<8x32xf32>,
    %17 = arith.mulf %11, %11 : vector<8x1xf32>
    %cst_8 = arith.constant 1.000000e+00 : f32
    %18 = vector.broadcast %cst_8 : f32 to vector<8x1xf32>
    %19 = arith.subf %18, %17 : vector<8x1xf32>
    %20 = vector.broadcast %1 : f32 to vector<8x1xf32>
    %21 = arith.mulf %20, %19 : vector<8x1xf32>
    %cst_9 = arith.constant 1.000000e+00 : f32
    %22 = vector.broadcast %cst_9 : f32 to vector<8x1xf32>
    %23 = arith.addf %22, %21 : vector<8x1xf32>
    %24 = math.absf %23 : vector<8x1xf32>
    %cst_10 = arith.constant 1.000000e-15 : f32
    %25 = vector.broadcast %cst_10 : f32 to vector<8x1xf32>
    %26 = arith.addf %24, %25 : vector<8x1xf32>
    %27 = math.log %26 : vector<8x1xf32>
    %c0_11 = arith.constant 0 : index
    %c0_12 = arith.constant 0 : index
    %28 = vector.load %arg6[%c0_11, %c0_12] : memref<8x1xf32, #tpu.memory_space<vmem>>, vector<8x1xf32>
    tpu.vector_store %arg6[%c0_11, %c0_12], %27 {strides = array<i32>} : memref<8x1xf32, #tpu.memory_space<vmem>>, vector<8x1xf32>,
    return
  }
  func.func @transform_0(%arg0: i32) -> i32 {
    %c0_i32 = arith.constant 0 : i32
    %c0_i32_0 = arith.constant 0 : i32
    return %c0_i32 : i32
  }
  func.func @transform_1(%arg0: i32) -> (i32, i32) {
    %c0_i32 = arith.constant 0 : i32
    %c0_i32_0 = arith.constant 0 : i32
    %c0_i32_1 = arith.constant 0 : i32
    return %c0_i32, %c0_i32_0 : i32, i32
  }
  func.func @transform_2(%arg0: i32) -> (i32, i32) {
    %c0_i32 = arith.constant 0 : i32
    %c0_i32_0 = arith.constant 0 : i32
    %c0_i32_1 = arith.constant 0 : i32
    return %c0_i32, %c0_i32_0 : i32, i32
  }
  func.func @transform_3(%arg0: i32) -> (i32, i32) {
    %c0_i32 = arith.constant 0 : i32
    %c0_i32_0 = arith.constant 0 : i32
    return %arg0, %c0_i32 : i32, i32
  }
  func.func @transform_4(%arg0: i32) -> (i32, i32) {
    %c0_i32 = arith.constant 0 : i32
    %c0_i32_0 = arith.constant 0 : i32
    return %arg0, %c0_i32 : i32, i32
  }
  func.func @transform_5(%arg0: i32) -> (i32, i32) {
    %c0_i32 = arith.constant 0 : i32
    %c0_i32_0 = arith.constant 0 : i32
    return %arg0, %c0_i32 : i32, i32
  }
}

</mosaic_0001>

<bundles_post_ra>
// kernel: tpu_custom_call.1
= control target key start
LH: loop header
LB: loop body
LE: loop exit
PB: predicated region body
PF: predicated region fallthrough
CT: control target
= control target key end

     0   :  { %11 = vsyncpa [#allocation5], 0  ;;  %s274_s0 = inlined_call_operand.hbm [shape: f32[2], index: 0, kind: input, shape index: {}]   ;;  %s275_s1 = inlined_call_operand.hbm [shape: f32[1,32], index: 1, kind: input, shape index: {}]   ;;  %s276_s2 = inlined_call_operand.vmem [shape: f32[1,32], index: 2, kind: input, shape index: {}]   ;;  %s277_s3 = inlined_call_operand.hbm [shape: f32[8,32], index: 3, kind: input, shape index: {}]   ;;  %s278_s4 = inlined_call_operand.hbm [shape: f32[8,32], index: 4, kind: output, shape index: {0}]   ;;  %s279_s5 = inlined_call_operand.vmem [shape: f32[8,1], index: 5, kind: output, shape index: {1}]  }
   0x1   :  { %12 = vsyncpa [#allocation3], 0 }
   0x2   :  { %13 = vsyncpa [#allocation8], 0 }
   0x3   :  { %14 = vsyncpa [#allocation4], 0  ;;  %s20_s20 = sshll.u32 %s274_s0, 4  ;;  %s29_s23 = sshll.u32 %s275_s1, 4  ;;  %s21_s20 = int_to_ptr.hbm [resolvable:$true] %s20_s20  ;;  %s30_s23 = int_to_ptr.hbm [resolvable:$true] %s29_s23 }
   0x4   :  { %s220_s24 = smov [#allocation2]   ;;  %s221_s25 = smov [#allocation6]  }
   0x5   :  { %23 = dma.hbm_to_smem %s21_s20, 16, %s220_s24, [#allocation5]  }
   0x6   :  { %s31_s26 = sshll.u32 %s221_s25, 4  ;;  %s42_s29 = sshll.u32 %s277_s3, 4  ;;  %s32_s26 = int_to_ptr.vmem [resolvable:$true] %s31_s26  ;;  %s43_s29 = int_to_ptr.hbm [resolvable:$true] %s42_s29 }
   0x7   :  { %34 = dma.hbm_to_vmem [thread:$0]  %s30_s23, 16, %s32_s26, [#allocation3]  }
   0x8   :  { %s222_s30 = smov [#allocation7]  }
   0x9   :  { %s44_s6 = sshll.u32 %s222_s30, 4  ;;  %s45_s6 = int_to_ptr.vmem [resolvable:$true] %s44_s6 }
   0xa   :  { %47 = dma.hbm_to_vmem [thread:$0]  %s43_s29, 128, %s45_s6, [#allocation8]  }
   0xb   :  { %212 = dma.done.wait [#allocation5], 16  }
   0xc   :  { %213 = vsyncadd [#allocation5], 4294967280 }
   0xd   :  { %214 = dma.done.wait [#allocation3], 16  }
   0xe   :  { %215 = vsyncadd [#allocation3], 4294967280 }
   0xf   :  { %216 = dma.done.wait [#allocation8], 128  }
  0x10   :  { %217 = vsyncadd [#allocation8], 4294967168 }
  0x11   :  { %60 = sfence }
  0x12   :  { %v63_v0 = vld [vmem:[#allocation7] sm:$0xff]  ;;  %v122_v1 = vld [vmem:[%s276_s2] ss:$0 sm:$0xff]  ;;  %vm70_vm0 = vcmask 261120   ;;  %s61_s3 = sld [smem:[#allocation2]]  ;;  %s223_s8 = smov [#allocation9]  }
  0x13   :  { %v69_v2 = vmul.f32 %v122_v1, %v63_v0  ;;  %s117_s7 = sld [smem:[#allocation2 + $0x1]]  ;;  %v123_v7 = vld [vmem:[#allocation6] ss:$0 sm:$0xff]  ;;  %s99_s9 = sshll.u32 %s223_s8, 4  ;;  %vm92_vm1 = vcmask 7168   ;;  %s100_s9 = int_to_ptr.vmem [resolvable:$true] %s99_s9 }
  0x14   :  { %s101_s12 = sshll.u32 %s278_s4, 4  ;;  %s102_s12 = int_to_ptr.hbm [resolvable:$true] %s101_s12 }
  0x15   :  { %v71_v3 = vsel %vm70_vm0, %v69_v2, 0.0 }
  0x16   :  { %72 = vadd.xlane.f32.xlu0 %v71_v3 }
  0x18   :  { %v74_v4 = vstv %s61_s3 }
  0x19   :  { %v85_v11 = vstv %s117_s7 }
  0x89   :  { %v73_v5 = vpop.xlane.xlu0 %72 }
  0x8a   :  { %v75_v6 = vadd.f32 %v74_v4, %v73_v5 }
  0x8c   :  { %124 = vtanh.f32 %v75_v6 }
  0x92   :  { %v125_v8 = vpop.eup %124 }
  0x93   :  { %v83_v9 = vmul.f32 %v125_v8, %v125_v8  ;;  %v80_v10 = vmul.f32 %v125_v8, %v123_v7 }
  0x95   :  { %v84_v12 = vsub.f32 1.0, %v83_v9  ;;  %v81_v13 = vadd.f32 %v80_v10, %v63_v0 }
  0x97   :  { %v86_v14 = vmul.f32 %v85_v11, %v84_v12  ;;  %82 = vst.msk [vmem:[#allocation9] sm:$0xff] %vm70_vm0, %v81_v13 }
  0x98   :  { %104 = dma.vmem_to_hbm [thread:$0]  %s100_s9, 128, %s102_s12, [#allocation4]  }
  0x99   :  { %v87_v15 = vadd.f32 1.0, %v86_v14 }
  0x9b   :  { %v88_v16 = vand.u32 2147483647, %v87_v15 }
  0x9d   :  { %v89_v17 = vadd.f32 1e-15, %v88_v16 }
  0x9f   :  { %126 = vlog2.f32 %v89_v17 }
  0xa5   :  { %v127_v18 = vpop.eup %126 }
  0xa6   :  { %v91_v19 = vmul.f32 0.6931472, %v127_v18 }
  0xa8   :  { %93 = vst.msk [vmem:[%s279_s5] sm:$0xff] %vm92_vm1, %v91_v19 }
  0xa9   :  { %218 = dma.done.wait [#allocation4], 128  }
  0xaa   :  { %219 = vsyncadd [#allocation4], 4294967168 }
  0xab   :  { %113 = vsyncpa [#allocation3], 1 }
  0xac   :  { %114 = vsyncpa [#allocation8], 1 }
  0xad   :  { %115 = vsyncpa [#allocation4], 1 }
  0xae   :  { %116 = vsyncpa [#allocation5], 1 }

</bundles_post_ra>
